<compile_context>
chip_gen: v6e
topology: v6e:2x2x1
jax: 0.10.0
libtpu: 0.0.40
codegen_flags: <defaults>
</compile_context>

<pallas_src>
import jax
import jax.numpy as jnp
import numpy as np
from jax.experimental import pallas as pl
from jax.experimental.pallas import tpu as pltpu  # noqa: F401  (no manual DMA needed at this size)

# ---- model dims (small, consistent with the module's forward) ----
B, S, D = 2, 8, 32          # batch, seq, d_model  (EncoderLayer.size == D)
H = 4                       # attention heads
DK = D // H                 # per-head dim
DFF = 64                    # feed-forward hidden dim
EPS = 1e-6                  # LayerNorm eps (matches the PyTorch module)
N = B * S                   # flattened rows


# ---------------- LayerNorm variants ----------------
def _layernorm_ref(x, a, b):
    # Matches the PyTorch LayerNorm in the module:
    #   mean over last dim, std with Bessel correction (torch.std default),
    #   a * (x - mean) / (std + eps) + b
    mean = jnp.mean(x, axis=-1, keepdims=True)
    c = x - mean
    var = jnp.sum(c * c, axis=-1, keepdims=True) / (x.shape[-1] - 1)
    std = jnp.sqrt(var)
    return a * c / (std + EPS) + b


def _layernorm_fast(x, a, b):
    # Kernel-side version: same math, but the divide goes to the EUP slot.
    mean = jnp.mean(x, axis=-1, keepdims=True)
    c = x - mean
    var = jnp.sum(c * c, axis=-1, keepdims=True) * jnp.float32(1.0 / (x.shape[-1] - 1))
    std = jnp.sqrt(var)
    return a * c * pl.reciprocal(std + EPS, approx=True) + b


# ---------------- kernel ----------------
def encoder_layer_kernel(x_ref, maskb_ref, wqkv_ref, wo_ref, w12_ref, vec_ref,
                         out_ref):
    x = x_ref[...]                         # (N, D) f32 -- batch flattened into rows
    mask_bias = maskb_ref[...]             # (N, N) f32 additive mask (0 / -1e9)
    vec = vec_ref[...]                     # (8, 128) f32 packed small vectors
    scale = jnp.float32(1.0 / np.sqrt(DK))

    ln1a, ln1b, bo = vec[0, :D], vec[1, :D], vec[2, :D]
    ln2a, ln2b, b2 = vec[3, :D], vec[4, :D], vec[5, :D]
    bqkv = vec[6, :3 * D]                  # [bq | bk | bv]
    b1 = vec[7, :DFF]

    # -------- sublayer 0: x + SelfAttn(LayerNorm(x)) --------
    xn = _layernorm_fast(x, ln1a, ln1b)

    # Fused Q/K/V projection: one (16,32)x(32,96) bf16 MXU push, f32 accumulate.
    qkv = jnp.dot(xn.astype(jnp.bfloat16), wqkv_ref[...],
                  preferred_element_type=jnp.float32) + bqkv          # (N, 3D) f32
    q = qkv[:, :D].astype(jnp.bfloat16)
    k = qkv[:, D:2 * D].astype(jnp.bfloat16)
    v = qkv[:, 2 * D:].astype(jnp.bfloat16)

    ctx_heads = []
    for h in range(H):                     # static unrolled loop (H = 4)
        sl = slice(h * DK, (h + 1) * DK)   # static lane slice, width DK
        sc = jnp.dot(q[:, sl], k[:, sl].T, preferred_element_type=jnp.float32)
        sc = sc * scale + mask_bias        # additive mask (no compare/select)
        sc = sc - jnp.max(sc, axis=-1, keepdims=True)
        p = jnp.exp(sc)
        p = p * pl.reciprocal(jnp.sum(p, axis=-1, keepdims=True), approx=True)
        ctx_heads.append(jnp.dot(p.astype(jnp.bfloat16), v[:, sl],
                                 preferred_element_type=jnp.float32))  # (N, DK)
    ctx = jnp.concatenate(ctx_heads, axis=-1)                          # (N, D)

    # Single output projection (one MXU push instead of 4 accumulated ones).
    attn = jnp.dot(ctx.astype(jnp.bfloat16), wo_ref[...],
                   preferred_element_type=jnp.float32) + bo
    x1 = x + attn                          # residual (dropout = identity, eval)

    # -------- sublayer 1: x1 + FFN(LayerNorm(x1)) --------
    xn2 = _layernorm_fast(x1, ln2a, ln2b)
    w12 = w12_ref[...]                     # (D + DFF, DFF) bf16 packed slab
    hid = jnp.dot(xn2.astype(jnp.bfloat16), w12[:D, :],
                  preferred_element_type=jnp.float32) + b1             # (N, DFF)
    hid = jnp.maximum(hid, 0.0)
    ff = jnp.dot(hid.astype(jnp.bfloat16), w12[D:, :D],
                 preferred_element_type=jnp.float32) + b2              # (N, D)
    out_ref[...] = x1 + ff


# ---------------- one-time host-side packing (NOT in the per-call path) ----------------
def pack_params(params):
    (ln1a, ln1b, wq, bq, wk, bk, wv, bv, wo, bo,
     ln2a, ln2b, w1, b1, w2, b2) = params

    wqkv = jnp.concatenate([wq, wk, wv], axis=1).astype(jnp.bfloat16)   # (D, 3D)
    wo_b = wo.astype(jnp.bfloat16)                                      # (D, D)
    w2_pad = jnp.zeros((DFF, DFF), jnp.float32).at[:, :D].set(w2)
    w12 = jnp.concatenate([w1, w2_pad], axis=0).astype(jnp.bfloat16)    # (D+DFF, DFF)

    vec = jnp.zeros((8, 128), jnp.float32)                              # one padded vreg
    vec = vec.at[0, :D].set(ln1a)
    vec = vec.at[1, :D].set(ln1b)
    vec = vec.at[2, :D].set(bo)
    vec = vec.at[3, :D].set(ln2a)
    vec = vec.at[4, :D].set(ln2b)
    vec = vec.at[5, :D].set(b2)
    vec = vec.at[6, :3 * D].set(jnp.concatenate([bq, bk, bv]))
    vec = vec.at[7, :DFF].set(b1)
    return wqkv, wo_b, w12, vec


@jax.jit
def encoder_layer(x, mask, packed):
    wqkv, wo_b, w12, vec = packed

    # Flatten batch into rows; block-diagonal ADDITIVE mask keeps attention
    # per-batch (0 where allowed, -1e9 where masked / cross-batch).
    x_flat = x.reshape(N, D)
    eye = jnp.eye(B, dtype=jnp.float32)
    mask_big = jnp.einsum('bc,bij->bicj', eye, mask.astype(jnp.float32)).reshape(N, N)
    mask_bias = (mask_big - 1.0) * jnp.float32(1e9)

    # Single grid-less kernel invocation: every operand is one whole-array
    # VMEM block (total working set of a few KiB on any TPU generation).
    out = pl.pallas_call(
        encoder_layer_kernel,
        out_shape=jax.ShapeDtypeStruct((N, D), jnp.float32),
    )(x_flat, mask_bias, wqkv, wo_b, w12, vec)
    return out.reshape(B, S, D)


# ------------------ pure-JAX reference (for verification) ------------------
def reference(x, mask, params):
    (ln1a, ln1b, wq, bq, wk, bk, wv, bv, wo, bo,
     ln2a, ln2b, w1, b1, w2, b2) = params
    outs = []
    for b in range(B):
        xb, mb = x[b], mask[b]
        xn = _layernorm_ref(xb, ln1a, ln1b)
        q = xn @ wq + bq
        k = xn @ wk + bk
        v = xn @ wv + bv
        heads = []
        for h in range(H):
            qh, kh, vh = (t[:, h * DK:(h + 1) * DK] for t in (q, k, v))
            sc = qh @ kh.T / np.sqrt(DK)
            sc = jnp.where(mb > 0, sc, -1e9)
            p = jax.nn.softmax(sc, axis=-1)
            heads.append(p @ vh)
        ctx = jnp.concatenate(heads, axis=-1)
        x1 = xb + (ctx @ wo + bo)
        xn2 = _layernorm_ref(x1, ln2a, ln2b)
        ff = jnp.maximum(xn2 @ w1 + b1, 0.0) @ w2 + b2
        outs.append(x1 + ff)
    return jnp.stack(outs)


if __name__ == "__main__":
    key = jax.random.PRNGKey(0)
    keys = jax.random.split(key, 16)

    def nrm(k, shape, scale=0.1):
        return (scale * jax.random.normal(k, shape)).astype(jnp.float32)

    # Parameters in the module's natural layout (packing happens once below).
    params = [
        jnp.ones((D,), jnp.float32),                   # ln1 a_2
        jnp.zeros((D,), jnp.float32),                  # ln1 b_2
        nrm(keys[0], (D, D)), nrm(keys[1], (D,)),      # Wq, bq
        nrm(keys[2], (D, D)), nrm(keys[3], (D,)),      # Wk, bk
        nrm(keys[4], (D, D)), nrm(keys[5], (D,)),      # Wv, bv
        nrm(keys[6], (D, D)), nrm(keys[7], (D,)),      # Wo, bo
        jnp.ones((D,), jnp.float32),                   # ln2 a_2
        jnp.zeros((D,), jnp.float32),                  # ln2 b_2
        nrm(keys[8], (D, DFF)), nrm(keys[9], (DFF,)),  # W1, b1
        nrm(keys[10], (DFF, D)), nrm(keys[11], (D,)),  # W2, b2
    ]

    x = nrm(keys[12], (B, S, D), scale=1.0)
    # causal mask, shared structure across batch (1 = attend, 0 = masked)
    mask = jnp.broadcast_to(jnp.tril(jnp.ones((S, S), jnp.float32)), (B, S, S))

    packed = jax.block_until_ready(pack_params(params))   # one-time packing

    out = jax.block_until_ready(encoder_layer(x, mask, packed))
    ref = reference(x, mask, params)
    # tolerance accounts for bf16 MXU operands (f32 accumulation) and
    # pl.reciprocal(approx=True) in LayerNorm / softmax denominators
    np.testing.assert_allclose(np.asarray(out), np.asarray(ref), atol=2e-2, rtol=2e-2)
    print("KERNEL_OK")
</pallas_src>

<mosaic_0001>
module attributes {stable_mosaic.version = 11 : i64} {
  func.func @encoder_layer_kernel(%arg0: memref<16x32xf32, #tpu.memory_space<vmem>>, %arg1: memref<16x16xf32, #tpu.memory_space<vmem>>, %arg2: memref<32x96xbf16, #tpu.memory_space<vmem>>, %arg3: memref<32x32xbf16, #tpu.memory_space<vmem>>, %arg4: memref<96x64xbf16, #tpu.memory_space<vmem>>, %arg5: memref<8x128xf32, #tpu.memory_space<vmem>>, %arg6: memref<16x32xf32, #tpu.memory_space<vmem>>) attributes {dimension_semantics = [], scalar_prefetch = 0 : i64, scratch_operands = 0 : i64, tpu.core_type = #tpu.core_type<tc>} {
    %c0 = arith.constant 0 : index
    %c0_0 = arith.constant 0 : index
    %0 = vector.load %arg0[%c0, %c0_0] : memref<16x32xf32, #tpu.memory_space<vmem>>, vector<16x32xf32>
    %c0_1 = arith.constant 0 : index
    %c0_2 = arith.constant 0 : index
    %1 = vector.load %arg1[%c0_1, %c0_2] : memref<16x16xf32, #tpu.memory_space<vmem>>, vector<16x16xf32>
    %c0_3 = arith.constant 0 : index
    %c0_4 = arith.constant 0 : index
    %2 = vector.load %arg5[%c0_3, %c0_4] : memref<8x128xf32, #tpu.memory_space<vmem>>, vector<8x128xf32>
    %3 = vector.extract_strided_slice %2 {offsets = [0, 0], sizes = [1, 32], strides = [1, 1]} : vector<8x128xf32> to vector<1x32xf32>
    %4 = vector.shape_cast %3 : vector<1x32xf32> to vector<32xf32>
    %5 = vector.extract_strided_slice %2 {offsets = [1, 0], sizes = [1, 32], strides = [1, 1]} : vector<8x128xf32> to vector<1x32xf32>
    %6 = vector.shape_cast %5 : vector<1x32xf32> to vector<32xf32>
    %7 = vector.extract_strided_slice %2 {offsets = [2, 0], sizes = [1, 32], strides = [1, 1]} : vector<8x128xf32> to vector<1x32xf32>
    %8 = vector.shape_cast %7 : vector<1x32xf32> to vector<32xf32>
    %9 = vector.extract_strided_slice %2 {offsets = [3, 0], sizes = [1, 32], strides = [1, 1]} : vector<8x128xf32> to vector<1x32xf32>
    %10 = vector.shape_cast %9 : vector<1x32xf32> to vector<32xf32>
    %11 = vector.extract_strided_slice %2 {offsets = [4, 0], sizes = [1, 32], strides = [1, 1]} : vector<8x128xf32> to vector<1x32xf32>
    %12 = vector.shape_cast %11 : vector<1x32xf32> to vector<32xf32>
    %13 = vector.extract_strided_slice %2 {offsets = [5, 0], sizes = [1, 32], strides = [1, 1]} : vector<8x128xf32> to vector<1x32xf32>
    %14 = vector.shape_cast %13 : vector<1x32xf32> to vector<32xf32>
    %15 = vector.extract_strided_slice %2 {offsets = [6, 0], sizes = [1, 96], strides = [1, 1]} : vector<8x128xf32> to vector<1x96xf32>
    %16 = vector.shape_cast %15 : vector<1x96xf32> to vector<96xf32>
    %17 = vector.extract_strided_slice %2 {offsets = [7, 0], sizes = [1, 64], strides = [1, 1]} : vector<8x128xf32> to vector<1x64xf32>
    %18 = vector.shape_cast %17 : vector<1x64xf32> to vector<64xf32>
    %cst = arith.constant dense<0.000000e+00> : vector<16xf32>
    %19 = vector.multi_reduction <add>, %0, %cst [1] : vector<16x32xf32> to vector<16xf32>
    %20 = vector.shape_cast %19 : vector<16xf32> to vector<16x1xf32>
    %cst_5 = arith.constant 3.200000e+01 : f32
    %21 = vector.broadcast %cst_5 : f32 to vector<16x1xf32>
    %22 = arith.divf %20, %21 : vector<16x1xf32>
    %23 = vector.broadcast %22 : vector<16x1xf32> to vector<16x32xf32>
    %24 = arith.subf %0, %23 : vector<16x32xf32>
    %25 = arith.mulf %24, %24 : vector<16x32xf32>
    %cst_6 = arith.constant dense<0.000000e+00> : vector<16xf32>
    %26 = vector.multi_reduction <add>, %25, %cst_6 [1] : vector<16x32xf32> to vector<16xf32>
    %27 = vector.shape_cast %26 : vector<16xf32> to vector<16x1xf32>
    %cst_7 = arith.constant 0.0322580636 : f32
    %28 = vector.broadcast %cst_7 : f32 to vector<16x1xf32>
    %29 = arith.mulf %27, %28 : vector<16x1xf32>
    %30 = math.sqrt %29 : vector<16x1xf32>
    %31 = vector.shape_cast %4 : vector<32xf32> to vector<1x32xf32>
    %32 = vector.broadcast %31 : vector<1x32xf32> to vector<16x32xf32>
    %33 = arith.mulf %32, %24 : vector<16x32xf32>
    %cst_8 = arith.constant 9.99999997E-7 : f32
    %34 = vector.broadcast %cst_8 : f32 to vector<16x1xf32>
    %35 = arith.addf %30, %34 : vector<16x1xf32>
    %36 = tpu.reciprocal %35 {approx = true} : vector<16x1xf32> -> vector<16x1xf32>
    %37 = vector.broadcast %36 : vector<16x1xf32> to vector<16x32xf32>
    %38 = arith.mulf %33, %37 : vector<16x32xf32>
    %39 = vector.shape_cast %6 : vector<32xf32> to vector<1x32xf32>
    %40 = vector.broadcast %39 : vector<1x32xf32> to vector<16x32xf32>
    %41 = arith.addf %38, %40 : vector<16x32xf32>
    %42 = arith.truncf %41 : vector<16x32xf32> to vector<16x32xbf16>
    %c0_9 = arith.constant 0 : index
    %c0_10 = arith.constant 0 : index
    %43 = vector.load %arg2[%c0_9, %c0_10] : memref<32x96xbf16, #tpu.memory_space<vmem>>, vector<32x96xbf16>
    %cst_11 = arith.constant dense<0.000000e+00> : vector<16x96xf32>
    %44 = tpu.matmul %42, %43, %cst_11 {dimension_numbers = #tpu.dot_dimension_numbers<[1], [0], [0], [1], [0, 0, 1, 1], [], []>} : vector<16x32xbf16>, vector<32x96xbf16>, vector<16x96xf32> -> vector<16x96xf32>
    %45 = vector.shape_cast %16 : vector<96xf32> to vector<1x96xf32>
    %46 = vector.broadcast %45 : vector<1x96xf32> to vector<16x96xf32>
    %47 = arith.addf %44, %46 : vector<16x96xf32>
    %48 = vector.extract_strided_slice %47 {offsets = [0, 0], sizes = [16, 32], strides = [1, 1]} : vector<16x96xf32> to vector<16x32xf32>
    %49 = arith.truncf %48 : vector<16x32xf32> to vector<16x32xbf16>
    %50 = vector.extract_strided_slice %47 {offsets = [0, 32], sizes = [16, 32], strides = [1, 1]} : vector<16x96xf32> to vector<16x32xf32>
    %51 = arith.truncf %50 : vector<16x32xf32> to vector<16x32xbf16>
    %52 = vector.extract_strided_slice %47 {offsets = [0, 64], sizes = [16, 32], strides = [1, 1]} : vector<16x96xf32> to vector<16x32xf32>
    %53 = arith.truncf %52 : vector<16x32xf32> to vector<16x32xbf16>
    %54 = vector.extract_strided_slice %49 {offsets = [0, 0], sizes = [16, 8], strides = [1, 1]} : vector<16x32xbf16> to vector<16x8xbf16>
    %55 = vector.extract_strided_slice %51 {offsets = [0, 0], sizes = [16, 8], strides = [1, 1]} : vector<16x32xbf16> to vector<16x8xbf16>
    %56 = tpu.transpose %55, [1, 0] : vector<16x8xbf16> -> vector<8x16xbf16>
    %cst_12 = arith.constant dense<0.000000e+00> : vector<16x16xf32>
    %57 = tpu.matmul %54, %56, %cst_12 {dimension_numbers = #tpu.dot_dimension_numbers<[1], [0], [0], [1], [0, 0, 1, 1], [], []>} : vector<16x8xbf16>, vector<8x16xbf16>, vector<16x16xf32> -> vector<16x16xf32>
    %cst_13 = arith.constant 0.353553385 : f32
    %58 = vector.broadcast %cst_13 : f32 to vector<16x16xf32>
    %59 = arith.mulf %57, %58 : vector<16x16xf32>
    %60 = arith.addf %59, %1 : vector<16x16xf32>
    %cst_14 = arith.constant dense<0xFF800000> : vector<16xf32>
    %61 = vector.multi_reduction <maximumf>, %60, %cst_14 [1] : vector<16x16xf32> to vector<16xf32>
    %62 = vector.shape_cast %61 : vector<16xf32> to vector<16x1xf32>
    %63 = vector.broadcast %62 : vector<16x1xf32> to vector<16x16xf32>
    %64 = arith.subf %60, %63 : vector<16x16xf32>
    %65 = math.exp %64 : vector<16x16xf32>
    %cst_15 = arith.constant dense<0.000000e+00> : vector<16xf32>
    %66 = vector.multi_reduction <add>, %65, %cst_15 [1] : vector<16x16xf32> to vector<16xf32>
    %67 = vector.shape_cast %66 : vector<16xf32> to vector<16x1xf32>
    %68 = tpu.reciprocal %67 {approx = true} : vector<16x1xf32> -> vector<16x1xf32>
    %69 = vector.broadcast %68 : vector<16x1xf32> to vector<16x16xf32>
    %70 = arith.mulf %65, %69 : vector<16x16xf32>
    %71 = arith.truncf %70 : vector<16x16xf32> to vector<16x16xbf16>
    %72 = vector.extract_strided_slice %53 {offsets = [0, 0], sizes = [16, 8], strides = [1, 1]} : vector<16x32xbf16> to vector<16x8xbf16>
    %cst_16 = arith.constant dense<0.000000e+00> : vector<16x8xf32>
    %73 = tpu.matmul %71, %72, %cst_16 {dimension_numbers = #tpu.dot_dimension_numbers<[1], [0], [0], [1], [0, 0, 1, 1], [], []>} : vector<16x16xbf16>, vector<16x8xbf16>, vector<16x8xf32> -> vector<16x8xf32>
    %74 = vector.extract_strided_slice %49 {offsets = [0, 8], sizes = [16, 8], strides = [1, 1]} : vector<16x32xbf16> to vector<16x8xbf16>
    %75 = vector.extract_strided_slice %51 {offsets = [0, 8], sizes = [16, 8], strides = [1, 1]} : vector<16x32xbf16> to vector<16x8xbf16>
    %76 = tpu.transpose %75, [1, 0] : vector<16x8xbf16> -> vector<8x16xbf16>
    %cst_17 = arith.constant dense<0.000000e+00> : vector<16x16xf32>
    %77 = tpu.matmul %74, %76, %cst_17 {dimension_numbers = #tpu.dot_dimension_numbers<[1], [0], [0], [1], [0, 0, 1, 1], [], []>} : vector<16x8xbf16>, vector<8x16xbf16>, vector<16x16xf32> -> vector<16x16xf32>
    %cst_18 = arith.constant 0.353553385 : f32
    %78 = vector.broadcast %cst_18 : f32 to vector<16x16xf32>
    %79 = arith.mulf %77, %78 : vector<16x16xf32>
    %80 = arith.addf %79, %1 : vector<16x16xf32>
    %cst_19 = arith.constant dense<0xFF800000> : vector<16xf32>
    %81 = vector.multi_reduction <maximumf>, %80, %cst_19 [1] : vector<16x16xf32> to vector<16xf32>
    %82 = vector.shape_cast %81 : vector<16xf32> to vector<16x1xf32>
    %83 = vector.broadcast %82 : vector<16x1xf32> to vector<16x16xf32>
    %84 = arith.subf %80, %83 : vector<16x16xf32>
    %85 = math.exp %84 : vector<16x16xf32>
    %cst_20 = arith.constant dense<0.000000e+00> : vector<16xf32>
    %86 = vector.multi_reduction <add>, %85, %cst_20 [1] : vector<16x16xf32> to vector<16xf32>
    %87 = vector.shape_cast %86 : vector<16xf32> to vector<16x1xf32>
    %88 = tpu.reciprocal %87 {approx = true} : vector<16x1xf32> -> vector<16x1xf32>
    %89 = vector.broadcast %88 : vector<16x1xf32> to vector<16x16xf32>
    %90 = arith.mulf %85, %89 : vector<16x16xf32>
    %91 = arith.truncf %90 : vector<16x16xf32> to vector<16x16xbf16>
    %92 = vector.extract_strided_slice %53 {offsets = [0, 8], sizes = [16, 8], strides = [1, 1]} : vector<16x32xbf16> to vector<16x8xbf16>
    %cst_21 = arith.constant dense<0.000000e+00> : vector<16x8xf32>
    %93 = tpu.matmul %91, %92, %cst_21 {dimension_numbers = #tpu.dot_dimension_numbers<[1], [0], [0], [1], [0, 0, 1, 1], [], []>} : vector<16x16xbf16>, vector<16x8xbf16>, vector<16x8xf32> -> vector<16x8xf32>
    %94 = vector.extract_strided_slice %49 {offsets = [0, 16], sizes = [16, 8], strides = [1, 1]} : vector<16x32xbf16> to vector<16x8xbf16>
    %95 = vector.extract_strided_slice %51 {offsets = [0, 16], sizes = [16, 8], strides = [1, 1]} : vector<16x32xbf16> to vector<16x8xbf16>
    %96 = tpu.transpose %95, [1, 0] : vector<16x8xbf16> -> vector<8x16xbf16>
    %cst_22 = arith.constant dense<0.000000e+00> : vector<16x16xf32>
    %97 = tpu.matmul %94, %96, %cst_22 {dimension_numbers = #tpu.dot_dimension_numbers<[1], [0], [0], [1], [0, 0, 1, 1], [], []>} : vector<16x8xbf16>, vector<8x16xbf16>, vector<16x16xf32> -> vector<16x16xf32>
    %cst_23 = arith.constant 0.353553385 : f32
    %98 = vector.broadcast %cst_23 : f32 to vector<16x16xf32>
    %99 = arith.mulf %97, %98 : vector<16x16xf32>
    %100 = arith.addf %99, %1 : vector<16x16xf32>
    %cst_24 = arith.constant dense<0xFF800000> : vector<16xf32>
    %101 = vector.multi_reduction <maximumf>, %100, %cst_24 [1] : vector<16x16xf32> to vector<16xf32>
    %102 = vector.shape_cast %101 : vector<16xf32> to vector<16x1xf32>
    %103 = vector.broadcast %102 : vector<16x1xf32> to vector<16x16xf32>
    %104 = arith.subf %100, %103 : vector<16x16xf32>
    %105 = math.exp %104 : vector<16x16xf32>
    %cst_25 = arith.constant dense<0.000000e+00> : vector<16xf32>
    %106 = vector.multi_reduction <add>, %105, %cst_25 [1] : vector<16x16xf32> to vector<16xf32>
    %107 = vector.shape_cast %106 : vector<16xf32> to vector<16x1xf32>
    %108 = tpu.reciprocal %107 {approx = true} : vector<16x1xf32> -> vector<16x1xf32>
    %109 = vector.broadcast %108 : vector<16x1xf32> to vector<16x16xf32>
    %110 = arith.mulf %105, %109 : vector<16x16xf32>
    %111 = arith.truncf %110 : vector<16x16xf32> to vector<16x16xbf16>
    %112 = vector.extract_strided_slice %53 {offsets = [0, 16], sizes = [16, 8], strides = [1, 1]} : vector<16x32xbf16> to vector<16x8xbf16>
    %cst_26 = arith.constant dense<0.000000e+00> : vector<16x8xf32>
    %113 = tpu.matmul %111, %112, %cst_26 {dimension_numbers = #tpu.dot_dimension_numbers<[1], [0], [0], [1], [0, 0, 1, 1], [], []>} : vector<16x16xbf16>, vector<16x8xbf16>, vector<16x8xf32> -> vector<16x8xf32>
    %114 = vector.extract_strided_slice %49 {offsets = [0, 24], sizes = [16, 8], strides = [1, 1]} : vector<16x32xbf16> to vector<16x8xbf16>
    %115 = vector.extract_strided_slice %51 {offsets = [0, 24], sizes = [16, 8], strides = [1, 1]} : vector<16x32xbf16> to vector<16x8xbf16>
    %116 = tpu.transpose %115, [1, 0] : vector<16x8xbf16> -> vector<8x16xbf16>
    %cst_27 = arith.constant dense<0.000000e+00> : vector<16x16xf32>
    %117 = tpu.matmul %114, %116, %cst_27 {dimension_numbers = #tpu.dot_dimension_numbers<[1], [0], [0], [1], [0, 0, 1, 1], [], []>} : vector<16x8xbf16>, vector<8x16xbf16>, vector<16x16xf32> -> vector<16x16xf32>
    %cst_28 = arith.constant 0.353553385 : f32
    %118 = vector.broadcast %cst_28 : f32 to vector<16x16xf32>
    %119 = arith.mulf %117, %118 : vector<16x16xf32>
    %120 = arith.addf %119, %1 : vector<16x16xf32>
    %cst_29 = arith.constant dense<0xFF800000> : vector<16xf32>
    %121 = vector.multi_reduction <maximumf>, %120, %cst_29 [1] : vector<16x16xf32> to vector<16xf32>
    %122 = vector.shape_cast %121 : vector<16xf32> to vector<16x1xf32>
    %123 = vector.broadcast %122 : vector<16x1xf32> to vector<16x16xf32>
    %124 = arith.subf %120, %123 : vector<16x16xf32>
    %125 = math.exp %124 : vector<16x16xf32>
    %cst_30 = arith.constant dense<0.000000e+00> : vector<16xf32>
    %126 = vector.multi_reduction <add>, %125, %cst_30 [1] : vector<16x16xf32> to vector<16xf32>
    %127 = vector.shape_cast %126 : vector<16xf32> to vector<16x1xf32>
    %128 = tpu.reciprocal %127 {approx = true} : vector<16x1xf32> -> vector<16x1xf32>
    %129 = vector.broadcast %128 : vector<16x1xf32> to vector<16x16xf32>
    %130 = arith.mulf %125, %129 : vector<16x16xf32>
    %131 = arith.truncf %130 : vector<16x16xf32> to vector<16x16xbf16>
    %132 = vector.extract_strided_slice %53 {offsets = [0, 24], sizes = [16, 8], strides = [1, 1]} : vector<16x32xbf16> to vector<16x8xbf16>
    %cst_31 = arith.constant dense<0.000000e+00> : vector<16x8xf32>
    %133 = tpu.matmul %131, %132, %cst_31 {dimension_numbers = #tpu.dot_dimension_numbers<[1], [0], [0], [1], [0, 0, 1, 1], [], []>} : vector<16x16xbf16>, vector<16x8xbf16>, vector<16x8xf32> -> vector<16x8xf32>
    %134 = tpu.concatenate %73, %93, %113, %133 in 1 : vector<16x8xf32>, vector<16x8xf32>, vector<16x8xf32>, vector<16x8xf32> -> vector<16x32xf32>
    %135 = arith.truncf %134 : vector<16x32xf32> to vector<16x32xbf16>
    %c0_32 = arith.constant 0 : index
    %c0_33 = arith.constant 0 : index
    %136 = vector.load %arg3[%c0_32, %c0_33] : memref<32x32xbf16, #tpu.memory_space<vmem>>, vector<32x32xbf16>
    %cst_34 = arith.constant dense<0.000000e+00> : vector<16x32xf32>
    %137 = tpu.matmul %135, %136, %cst_34 {dimension_numbers = #tpu.dot_dimension_numbers<[1], [0], [0], [1], [0, 0, 1, 1], [], []>} : vector<16x32xbf16>, vector<32x32xbf16>, vector<16x32xf32> -> vector<16x32xf32>
    %138 = vector.shape_cast %8 : vector<32xf32> to vector<1x32xf32>
    %139 = vector.broadcast %138 : vector<1x32xf32> to vector<16x32xf32>
    %140 = arith.addf %137, %139 : vector<16x32xf32>
    %141 = arith.addf %0, %140 : vector<16x32xf32>
    %cst_35 = arith.constant dense<0.000000e+00> : vector<16xf32>
    %142 = vector.multi_reduction <add>, %141, %cst_35 [1] : vector<16x32xf32> to vector<16xf32>
    %143 = vector.shape_cast %142 : vector<16xf32> to vector<16x1xf32>
    %cst_36 = arith.constant 3.200000e+01 : f32
    %144 = vector.broadcast %cst_36 : f32 to vector<16x1xf32>
    %145 = arith.divf %143, %144 : vector<16x1xf32>
    %146 = vector.broadcast %145 : vector<16x1xf32> to vector<16x32xf32>
    %147 = arith.subf %141, %146 : vector<16x32xf32>
    %148 = arith.mulf %147, %147 : vector<16x32xf32>
    %cst_37 = arith.constant dense<0.000000e+00> : vector<16xf32>
    %149 = vector.multi_reduction <add>, %148, %cst_37 [1] : vector<16x32xf32> to vector<16xf32>
    %150 = vector.shape_cast %149 : vector<16xf32> to vector<16x1xf32>
    %cst_38 = arith.constant 0.0322580636 : f32
    %151 = vector.broadcast %cst_38 : f32 to vector<16x1xf32>
    %152 = arith.mulf %150, %151 : vector<16x1xf32>
    %153 = math.sqrt %152 : vector<16x1xf32>
    %154 = vector.shape_cast %10 : vector<32xf32> to vector<1x32xf32>
    %155 = vector.broadcast %154 : vector<1x32xf32> to vector<16x32xf32>
    %156 = arith.mulf %155, %147 : vector<16x32xf32>
    %cst_39 = arith.constant 9.99999997E-7 : f32
    %157 = vector.broadcast %cst_39 : f32 to vector<16x1xf32>
    %158 = arith.addf %153, %157 : vector<16x1xf32>
    %159 = tpu.reciprocal %158 {approx = true} : vector<16x1xf32> -> vector<16x1xf32>
    %160 = vector.broadcast %159 : vector<16x1xf32> to vector<16x32xf32>
    %161 = arith.mulf %156, %160 : vector<16x32xf32>
    %162 = vector.shape_cast %12 : vector<32xf32> to vector<1x32xf32>
    %163 = vector.broadcast %162 : vector<1x32xf32> to vector<16x32xf32>
    %164 = arith.addf %161, %163 : vector<16x32xf32>
    %c0_40 = arith.constant 0 : index
    %c0_41 = arith.constant 0 : index
    %165 = vector.load %arg4[%c0_40, %c0_41] : memref<96x64xbf16, #tpu.memory_space<vmem>>, vector<96x64xbf16>
    %166 = arith.truncf %164 : vector<16x32xf32> to vector<16x32xbf16>
    %167 = vector.extract_strided_slice %165 {offsets = [0, 0], sizes = [32, 64], strides = [1, 1]} : vector<96x64xbf16> to vector<32x64xbf16>
    %cst_42 = arith.constant dense<0.000000e+00> : vector<16x64xf32>
    %168 = tpu.matmul %166, %167, %cst_42 {dimension_numbers = #tpu.dot_dimension_numbers<[1], [0], [0], [1], [0, 0, 1, 1], [], []>} : vector<16x32xbf16>, vector<32x64xbf16>, vector<16x64xf32> -> vector<16x64xf32>
    %169 = vector.shape_cast %18 : vector<64xf32> to vector<1x64xf32>
    %170 = vector.broadcast %169 : vector<1x64xf32> to vector<16x64xf32>
    %171 = arith.addf %168, %170 : vector<16x64xf32>
    %cst_43 = arith.constant 0.000000e+00 : f32
    %172 = vector.broadcast %cst_43 : f32 to vector<16x64xf32>
    %173 = arith.maximumf %171, %172 : vector<16x64xf32>
    %174 = arith.truncf %173 : vector<16x64xf32> to vector<16x64xbf16>
    %175 = vector.extract_strided_slice %165 {offsets = [32, 0], sizes = [64, 32], strides = [1, 1]} : vector<96x64xbf16> to vector<64x32xbf16>
    %cst_44 = arith.constant dense<0.000000e+00> : vector<16x32xf32>
    %176 = tpu.matmul %174, %175, %cst_44 {dimension_numbers = #tpu.dot_dimension_numbers<[1], [0], [0], [1], [0, 0, 1, 1], [], []>} : vector<16x64xbf16>, vector<64x32xbf16>, vector<16x32xf32> -> vector<16x32xf32>
    %177 = vector.shape_cast %14 : vector<32xf32> to vector<1x32xf32>
    %178 = vector.broadcast %177 : vector<1x32xf32> to vector<16x32xf32>
    %179 = arith.addf %176, %178 : vector<16x32xf32>
    %180 = arith.addf %141, %179 : vector<16x32xf32>
    %c0_45 = arith.constant 0 : index
    %c0_46 = arith.constant 0 : index
    %181 = vector.load %arg6[%c0_45, %c0_46] : memref<16x32xf32, #tpu.memory_space<vmem>>, vector<16x32xf32>
    tpu.vector_store %arg6[%c0_45, %c0_46], %180 {strides = array<i32>} : memref<16x32xf32, #tpu.memory_space<vmem>>, vector<16x32xf32>,
    return
  }
}

</mosaic_0001>

<bundles_post_ra>
// kernel: encoder_layer.1
= control target key start
LH: loop header
LB: loop body
LE: loop exit
PB: predicated region body
PF: predicated region fallthrough
CT: control target
= control target key end

     0   :  { %vm30_vm0 = vcmask 261120   ;;  %s1463_s0 = inlined_call_operand.vmem [shape: f32[16,32], index: 0, kind: input, shape index: {}]   ;;  %s1464_s1 = inlined_call_operand.vmem [shape: f32[16,16], index: 1, kind: input, shape index: {}]   ;;  %s1465_s2 = inlined_call_operand.vmem [shape: bf16[32,96], index: 2, kind: input, shape index: {}]   ;;  %s1466_s3 = inlined_call_operand.vmem [shape: bf16[32,32], index: 3, kind: input, shape index: {}]   ;;  %s1467_s4 = inlined_call_operand.vmem [shape: bf16[96,64], index: 4, kind: input, shape index: {}]   ;;  %s1468_s5 = inlined_call_operand.vmem [shape: f32[8,128], index: 5, kind: input, shape index: {}]   ;;  %s1469_s6 = inlined_call_operand.hbm [shape: f32[16,32], index: 6, kind: output, shape index: {}]  }
   0x1   :  { %v1275_v0 = vld [vmem:[%s1463_s0] sm:$0xff]  ;;  %v1280_v1 = vld [vmem:[%s1463_s0 + $0x8] sm:$0xff] }
   0x2   :  { %v31_v2 = vsel %vm30_vm0, %v1275_v0, 0.0  ;;  %v34_v3 = vsel %vm30_vm0, %v1280_v1, 0.0 }
   0x3   :  { %32 = vadd.xlane.f32.xlu0 %v31_v2 }
   0x7   :  { %35 = vadd.xlane.f32.xlu0 %v34_v3 }
   0x8   :  { %11 = vsyncpa [#allocation3], 0  ;;  %v1139_v14 = vld [vmem:[%s1465_s2 + $0x8] sm:$0xff]   ;;  %v1219_v15 = vmov 0.0   ;;  %vm1220_vm1 = vmmov 0   ;;  %v1140_v16 = vld [vmem:[%s1465_s2] sm:$0xff]   ;;  %v66_v27 = vlaneseq }
   0x9   :  { %1022 = vmatprep.subr.bf16.mxu0 %v1219_v15  ;;  %1026 = vmatprep.mubr.msk.bf16.mxu0 %vm1220_vm1, %v1219_v15  ;;  %v1310_v36 = vld [vmem:[%s1468_s5] sm:$0xff]  ;;  %s1221_s5 = smov 88   ;;  %s1222_s29 = smov 96   ;;  %vm153_vm6 = vcmask 64512   ;;  %vm205_vm7 = vcmask 130048   ;;  %vm679_vm8 = vcmask 195584  }
   0xa   :  { %1023 = vmatpush3.bf16.msra.mxu0 %v1139_v14  ;;  %1030 = vmatprep.subr.bf16.mxu1 %v1219_v15  ;;  %v1304_v33 = vshrl.u32 %v66_v27, 7  ;;  %s1223_s30 = smov 120   ;;  %s1224_s7 = smov 112   ;;  %vm905_vm13 = vcmask 523264  }
   0xb   :  { %1024 = vmatprep.subr.bf16.mxu0 %v1219_v15  ;;  %1032 = vmatprep.mubr.msk.bf16.mxu1 %vm1220_vm1, %v1219_v15  ;;  %s1225_s8 = smov 80   ;;  %s1226_s9 = smov 104  }
   0xc   :  { %v68_v35 = vsub.s32 0, %v1304_v33  ;;  %v80_v38 = vsub.s32 1, %v1304_v33  ;;  %v91_v49 = vsub.s32 6, %v1304_v33  ;;  %s1227_s10 = smov 72   ;;  %s1229_s15 = smov 48  }
   0xd   :  { %s1230_s16 = smov 40   ;;  %s1231_s17 = smov 56  }
   0xe   :  { %1025 = vmatpush3.bf16.msra.mxu0 %v1140_v16  ;;  %v69_v37 = vrot.slane %v1310_v36, %v68_v35  ;;  %v81_v43 = vrot.slane %v1310_v36, %v80_v38  ;;  %v92_v51 = vrot.slane %v1310_v36, %v91_v49  ;;  %s1232_s20 = smov 8   ;;  %s1233_s23 = smov 16  }
   0xf   :  { %1036 = vmatprep.subr.bf16.mxu0 %v1219_v15  ;;  %s1234_s24 = smov 24  }
  0x8c   :  { %v33_v4 = vpop.xlane.xlu0 %32 }
  0x8d   :  { %v38_v5 = vmul.f32 0.03125, %v33_v4 }
  0x8f   :  { %v40_v6 = vsub.f32 %v1275_v0, %v38_v5 }
  0x90   :  { %v36_v7 = vpop.xlane.xlu0 %35 }
  0x91   :  { %v39_v8 = vmul.f32 0.03125, %v36_v7  ;;  %v42_v9 = vmul.f32 %v40_v6, %v40_v6  ;;  %v70_v40 = vmul.f32 %v69_v37, %v40_v6 }
  0x93   :  { %v41_v10 = vsub.f32 %v1280_v1, %v39_v8  ;;  %v44_v11 = vsel %vm30_vm0, %v42_v9, 0.0  ;;  %v27_v8 = vld [vmem:[%s1464_s1] sm:$0xff] }
  0x94   :  { %45 = vadd.xlane.f32.xlu1 %v44_v11 }
  0x95   :  { %v43_v12 = vmul.f32 %v41_v10, %v41_v10  ;;  %v71_v41 = vmul.f32 %v69_v37, %v41_v10 }
  0x97   :  { %v47_v13 = vsel %vm30_vm0, %v43_v12, 0.0 }
  0x98   :  { %48 = vadd.xlane.f32.xlu1 %v47_v13  ;;  %v28_v13 = vld [vmem:[%s1464_s1 + $0x8] sm:$0xff]  ;;  %s1228_s1 = smov 64  }
 0x11d   :  { %v46_v17 = vpop.xlane.xlu1 %45 }
 0x11e   :  { %v50_v18 = vmul.f32 0.032258064, %v46_v17 }
 0x120   :  { %1149 = vrsqrt.f32 %v50_v18  ;;  %vm54_vm2 = vcmp.eq.f32.partialorder %v50_v18, inf  ;;  %v57_v23 = vand.u32 2147483648, %v50_v18  ;;  %vm56_vm3 = vcmp.eq.f32.partialorder %v50_v18, 0.0 }
 0x121   :  { %v49_v19 = vpop.xlane.xlu1 %48 }
 0x122   :  { %v51_v20 = vmul.f32 0.032258064, %v49_v19 }
 0x124   :  { %1151 = vrsqrt.f32 %v51_v20  ;;  %vm61_vm4 = vcmp.eq.f32.partialorder %v51_v20, inf  ;;  %v64_v30 = vand.u32 2147483648, %v51_v20  ;;  %vm63_vm5 = vcmp.eq.f32.partialorder %v51_v20, 0.0 }
 0x12d   :  { %v1150_v21 = vpop.eup %1149 }
 0x12e   :  { %v53_v22 = vmul.f32 %v1150_v21, %v50_v18 }
 0x130   :  { %v55_v24 = vsel %vm54_vm2, %v50_v18, %v53_v22 }
 0x131   :  { %v1152_v25 = vpop.eup %1151  ;;  %v58_v26 = vsel %vm56_vm3, %v57_v23, %v55_v24 }
 0x132   :  { %v72_v28 = vadd.f32 1e-06, %v58_v26  ;;  %v60_v29 = vmul.f32 %v1152_v25, %v51_v20 }
 0x134   :  { %1153 = vrcp.f32 %v72_v28  ;;  %v62_v31 = vsel %vm61_vm4, %v51_v20, %v60_v29 }
 0x135   :  { %v65_v32 = vsel %vm63_vm5, %v64_v30, %v62_v31 }
 0x136   :  { %v73_v34 = vadd.f32 1e-06, %v65_v32 }
 0x138   :  { %1155 = vrcp.f32 %v73_v34 }
 0x141   :  { %v1154_v39 = vpop.eup %1153 }
 0x142   :  { %v76_v42 = vmul.f32 %v1154_v39, %v70_v40 }
 0x144   :  { %v82_v46 = vadd.f32 %v81_v43, %v76_v42 }
 0x145   :  { %v1156_v44 = vpop.eup %1155 }
 0x146   :  { %v77_v45 = vmul.f32 %v1156_v44, %v71_v41 }
 0x148   :  { %v83_v47 = vadd.f32 %v81_v43, %v77_v45 }
 0x14a   :  { %v84_v48 = vpack.c.bf16 %v83_v47, %v82_v46 }
 0x14c   :  { %1027 = vmatmul.mubr.msk.bf16.vlgmr.msra.gmra.mxu0 %vm30_vm0, %v84_v48 }
 0x14d   :  { %1038 = vmatprep.mubr.msk.bf16.mxu0 %vm1220_vm1, %v1219_v15 }
 0x20c   :  { %v142_v50 = vpop.f32.mrf.mxu0 }
 0x20d   :  { %v143_v54 = vadd.f32 %v142_v50, %v92_v51 }
 0x20e   :  { %v1028_v52 = vpop.f32.mrf.mxu0 }
 0x210   :  { %v145_v53 = vpop.f32.mrf.mxu0 }
 0x211   :  { %v146_v55 = vadd.f32 %v145_v53, %v92_v51 }
 0x212   :  { %v1029_v56 = vpop.f32.mrf.mxu0 }
 0x213   :  { %v1320_v57 = vpack.c.bf16 %v146_v55, %v143_v54 }
 0x215   :  { %278 = vrot.lane.b32.xlu1 %v1320_v57, %s1221_s5  ;;  %151 = vrot.lane.b32.xlu0 %v1320_v57, %s1222_s29 }
 0x219   :  { %276 = vrot.lane.b32.xlu1 %v1320_v57, %s1223_s30  ;;  %401 = vrot.lane.b32.xlu0 %v1320_v57, %s1224_s7 }
 0x21d   :  { %403 = vrot.lane.b32.xlu1 %v1320_v57, %s1225_s8  ;;  %526 = vrot.lane.b32.xlu0 %v1320_v57, %s1226_s9 }
 0x221   :  { %528 = vrot.lane.b32.xlu1 %v1320_v57, %s1227_s10 }
 0x287   :  { %v152_v58 = vpop.permute.xlu0 %151  ;;  %v279_v60 = vpop.permute.xlu1 %278 }
 0x288   :  { %v158_v59 = vsel %vm153_vm6, %v152_v58, 0  ;;  %v284_v62 = vsel %vm153_vm6, %v279_v60, 0 }
 0x289   :  { %1031 = vmatpush3.bf16.xpose.msra.mxu1 %v158_v59 }
 0x28a   :  { %1042 = vmatprep.subr.bf16.mxu1 %v1219_v15 }
 0x28b   :  { %v277_v61 = vpop.permute.xlu1 %276  ;;  %v402_v4 = vpop.permute.xlu0 %401 }
 0x28f   :  { %v404_v63 = vpop.permute.xlu1 %403  ;;  %v527_v6 = vpop.permute.xlu0 %526 }
 0x290   :  { %1033 = vmatmul.mubr.msk.bf16.vlgmr.msra.gmra.mxu1 %vm153_vm6, %v1320_v57  ;;  %v409_v2 = vsel %vm153_vm6, %v404_v63, 0 }
 0x291   :  { %1043 = vmatpush3.bf16.xpose.msra.mxu1 %v284_v62  ;;  %1044 = vmatprep.mubr.msk.bf16.mxu1 %vm1220_vm1, %v1219_v15 }
 0x292   :  { %1054 = vmatprep.subr.bf16.mxu1 %v1219_v15 }
 0x293   :  { %v529_v3 = vpop.permute.xlu1 %528 }
 0x294   :  { %v534_v5 = vsel %vm153_vm6, %v529_v3, 0 }
 0x298   :  { %1045 = vmatmul.mubr.msk.bf16.vlgmr.msra.gmra.mxu1 %vm153_vm6, %v277_v61 }
 0x299   :  { %1055 = vmatpush3.bf16.xpose.msra.mxu1 %v409_v2  ;;  %1056 = vmatprep.mubr.msk.bf16.mxu1 %vm1220_vm1, %v1219_v15 }
 0x29a   :  { %1066 = vmatprep.subr.bf16.mxu1 %v1219_v15 }
 0x2a0   :  { %1057 = vmatmul.mubr.msk.bf16.vlgmr.msra.gmra.mxu1 %vm153_vm6, %v402_v4 }
 0x2a1   :  { %1067 = vmatpush3.bf16.xpose.msra.mxu1 %v534_v5  ;;  %1068 = vmatprep.mubr.msk.bf16.mxu1 %vm1220_vm1, %v1219_v15 }
 0x2a2   :  { %1078 = vmatprep.subr.bf16.mxu1 %v1219_v15 }
 0x2a8   :  { %1069 = vmatmul.mubr.msk.bf16.vlgmr.msra.gmra.mxu1 %vm153_vm6, %v527_v6 }
 0x2a9   :  { %1082 = vmatprep.mubr.msk.bf16.mxu1 %vm1220_vm1, %v1219_v15 }
 0x350   :  { %v194_v7 = vpop.f32.mrf.mxu1 }
 0x351   :  { %v201_v9 = vmul.f32 0.35355338, %v194_v7 }
 0x352   :  { %v1034_v10 = vpop.f32.mrf.mxu1 }
 0x353   :  { %v203_v11 = vadd.f32 %v201_v9, %v27_v8 }
 0x354   :  { %v197_v12 = vpop.f32.mrf.mxu1 }
 0x355   :  { %v202_v14 = vmul.f32 0.35355338, %v197_v12  ;;  %v206_v16 = vsel %vm205_vm7, %v203_v11, -inf }
 0x356   :  { %207 = vmax.xlane.f32.xlu1 %v206_v16  ;;  %v1035_v17 = vpop.f32.mrf.mxu1 }
 0x357   :  { %v204_v18 = vadd.f32 %v202_v14, %v28_v13 }
 0x358   :  { %v320_v19 = vpop.f32.mrf.mxu1 }
 0x359   :  { %v327_v20 = vmul.f32 0.35355338, %v320_v19  ;;  %v209_v21 = vsel %vm205_vm7, %v204_v18, -inf }
 0x35a   :  { %210 = vmax.xlane.f32.xlu0 %v209_v21  ;;  %v1046_v22 = vpop.f32.mrf.mxu1 }
 0x35b   :  { %v329_v23 = vadd.f32 %v327_v20, %v27_v8 }
 0x35c   :  { %v323_v24 = vpop.f32.mrf.mxu1 }
 0x35d   :  { %v328_v25 = vmul.f32 0.35355338, %v323_v24  ;;  %v331_v26 = vsel %vm205_vm7, %v329_v23, -inf }
 0x35e   :  { %332 = vmax.xlane.f32.xlu0 %v331_v26  ;;  %v1047_v27 = vpop.f32.mrf.mxu1 }
 0x35f   :  { %v330_v28 = vadd.f32 %v328_v25, %v28_v13 }
 0x360   :  { %v445_v29 = vpop.f32.mrf.mxu1 }
 0x361   :  { %v452_v30 = vmul.f32 0.35355338, %v445_v29  ;;  %v334_v31 = vsel %vm205_vm7, %v330_v28, -inf }
 0x362   :  { %335 = vmax.xlane.f32.xlu0 %v334_v31  ;;  %v1058_v32 = vpop.f32.mrf.mxu1 }
 0x363   :  { %v454_v34 = vadd.f32 %v452_v30, %v27_v8 }
 0x364   :  { %v448_v35 = vpop.f32.mrf.mxu1 }
 0x365   :  { %v453_v37 = vmul.f32 0.35355338, %v448_v35  ;;  %v456_v38 = vsel %vm205_vm7, %v454_v34, -inf }
 0x366   :  { %457 = vmax.xlane.f32.xlu1 %v456_v38  ;;  %v1059_v39 = vpop.f32.mrf.mxu1 }
 0x367   :  { %v455_v40 = vadd.f32 %v453_v37, %v28_v13 }
 0x368   :  { %v570_v41 = vpop.f32.mrf.mxu1 }
 0x369   :  { %v577_v42 = vmul.f32 0.35355338, %v570_v41  ;;  %v459_v43 = vsel %vm205_vm7, %v455_v40, -inf }
 0x36a   :  { %460 = vmax.xlane.f32.xlu0 %v459_v43  ;;  %v1070_v44 = vpop.f32.mrf.mxu1 }
 0x36b   :  { %v579_v45 = vadd.f32 %v577_v42, %v27_v8 }
 0x36c   :  { %v573_v46 = vpop.f32.mrf.mxu1 }
 0x36d   :  { %v578_v47 = vmul.f32 0.35355338, %v573_v46  ;;  %v581_v48 = vsel %vm205_vm7, %v579_v45, -inf }
 0x36e   :  { %582 = vmax.xlane.f32.xlu1 %v581_v48  ;;  %v1071_v49 = vpop.f32.mrf.mxu1 }
 0x36f   :  { %v580_v50 = vadd.f32 %v578_v47, %v28_v13 }
 0x371   :  { %v584_v51 = vsel %vm205_vm7, %v580_v50, -inf }
 0x372   :  { %585 = vmax.xlane.f32.xlu0 %v584_v51 }
 0x37f   :  { %229 = vrot.lane.b32.xlu1 %v1320_v57, %s1228_s1 }
 0x3df   :  { %v208_v52 = vpop.xlane.xlu1 %207 }
 0x3e0   :  { %v212_v53 = vsub.f32 %v203_v11, %v208_v52 }
 0x3e2   :  { %v214_v54 = vmul.f32 1.442695, %v212_v53 }
 0x3e3   :  { %v211_v55 = vpop.xlane.xlu0 %210 }
 0x3e4   :  { %1157 = vpow2.f32 %v214_v54  ;;  %v213_v56 = vsub.f32 %v204_v18, %v211_v55 }
 0x3e6   :  { %v216_v58 = vmul.f32 1.442695, %v213_v56 }
 0x3e7   :  { %v333_v59 = vpop.xlane.xlu0 %332 }
 0x3e8   :  { %1159 = vpow2.f32 %v216_v58  ;;  %v337_v60 = vsub.f32 %v329_v23, %v333_v59 }
 0x3ea   :  { %v339_v61 = vmul.f32 1.442695, %v337_v60 }
 0x3eb   :  { %v336_v62 = vpop.xlane.xlu0 %335 }
 0x3ec   :  { %1161 = vpow2.f32 %v339_v61  ;;  %v338_v63 = vsub.f32 %v330_v28, %v336_v62 }
 0x3ee   :  { %v341_v2 = vmul.f32 1.442695, %v338_v63 }
 0x3ef   :  { %v458_v3 = vpop.xlane.xlu1 %457 }
 0x3f0   :  { %1163 = vpow2.f32 %v341_v2  ;;  %v462_v4 = vsub.f32 %v454_v34, %v458_v3 }
 0x3f1   :  { %v1158_v5 = vpop.eup %1157 }
 0x3f2   :  { %v464_v6 = vmul.f32 1.442695, %v462_v4  ;;  %v218_v7 = vsel %vm205_vm7, %v1158_v5, 0.0 }
 0x3f3   :  { %219 = vadd.xlane.f32.xlu1 %v218_v7  ;;  %v461_v8 = vpop.xlane.xlu0 %460 }
 0x3f4   :  { %1165 = vpow2.f32 %v464_v6  ;;  %v463_v9 = vsub.f32 %v455_v40, %v461_v8 }
 0x3f5   :  { %v1160_v10 = vpop.eup %1159 }
 0x3f6   :  { %v466_v11 = vmul.f32 1.442695, %v463_v9  ;;  %v221_v12 = vsel %vm205_vm7, %v1160_v10, 0.0 }
 0x3f7   :  { %v583_v13 = vpop.xlane.xlu1 %582  ;;  %222 = vadd.xlane.f32.xlu0 %v221_v12 }
 0x3f8   :  { %1167 = vpow2.f32 %v466_v11  ;;  %v587_v14 = vsub.f32 %v579_v45, %v583_v13  ;;  %v1141_v11 = vld [vmem:[%s1466_s3 + $0x8] sm:$0xff]  }
 0x3f9   :  { %v1162_v16 = vpop.eup %1161  ;;  %1079 = vmatpush3.bf16.msra.mxu1 %v1141_v11 }
 0x3fa   :  { %v589_v17 = vmul.f32 1.442695, %v587_v14  ;;  %v343_v18 = vsel %vm205_vm7, %v1162_v16, 0.0  ;;  %1080 = vmatprep.subr.bf16.mxu1 %v1219_v15 }
 0x3fb   :  { %v230_v19 = vpop.permute.xlu1 %229  ;;  %344 = vadd.xlane.f32.xlu1 %v343_v18  ;;  %v586_v20 = vpop.xlane.xlu0 %585 }
 0x3fc   :  { %1169 = vpow2.f32 %v589_v17  ;;  %v588_v21 = vsub.f32 %v580_v50, %v586_v20  ;;  %1037 = vmatpush3.bf16.msra.mxu0 %v230_v19  ;;  %v1142_v17 = vld [vmem:[%s1466_s3] sm:$0xff]  }
 0x3fd   :  { %v1164_v22 = vpop.eup %1163  ;;  %1048 = vmatprep.subr.bf16.mxu0 %v1219_v15  ;;  %1081 = vmatpush3.bf16.msra.mxu1 %v1142_v17 }
 0x3fe   :  { %v591_v23 = vmul.f32 1.442695, %v588_v21  ;;  %v346_v24 = vsel %vm205_vm7, %v1164_v22, 0.0  ;;  %1094 = vmatprep.subr.bf16.mxu1 %v1219_v15 }
 0x3ff   :  { %347 = vadd.xlane.f32.xlu0 %v346_v24 }
 0x400   :  { %1171 = vpow2.f32 %v591_v23 }
 0x401   :  { %v1166_v25 = vpop.eup %1165 }
 0x402   :  { %v468_v26 = vsel %vm205_vm7, %v1166_v25, 0.0 }
 0x403   :  { %469 = vadd.xlane.f32.xlu1 %v468_v26 }
 0x405   :  { %v1168_v27 = vpop.eup %1167 }
 0x406   :  { %v471_v28 = vsel %vm205_vm7, %v1168_v27, 0.0 }
 0x407   :  { %472 = vadd.xlane.f32.xlu0 %v471_v28 }
 0x409   :  { %v1170_v29 = vpop.eup %1169 }
 0x40a   :  { %v593_v30 = vsel %vm205_vm7, %v1170_v29, 0.0 }
 0x40b   :  { %594 = vadd.xlane.f32.xlu1 %v593_v30 }
 0x40d   :  { %v1172_v31 = vpop.eup %1171 }
 0x40e   :  { %v596_v32 = vsel %vm205_vm7, %v1172_v31, 0.0 }
 0x40f   :  { %597 = vadd.xlane.f32.xlu0 %v596_v32 }
 0x41c   :  { %479 = vrot.lane.b32.xlu1 %v1320_v57, %s1229_s15 }
 0x420   :  { %604 = vrot.lane.b32.xlu1 %v1320_v57, %s1230_s16 }
 0x425   :  { %354 = vrot.lane.b32.xlu0 %v1320_v57, %s1231_s17 }
 0x47c   :  { %v220_v34 = vpop.xlane.xlu1 %219 }
 0x47d   :  { %1173 = vrcp.f32 %v220_v34 }
 0x480   :  { %v223_v35 = vpop.xlane.xlu0 %222 }
 0x481   :  { %1175 = vrcp.f32 %v223_v35 }
 0x484   :  { %v345_v38 = vpop.xlane.xlu1 %344 }
 0x488   :  { %v348_v37 = vpop.xlane.xlu0 %347 }
 0x489   :  { %1177 = vrcp.f32 %v348_v37 }
 0x48a   :  { %v1174_v39 = vpop.eup %1173  ;;  %1179 = vrcp.f32 %v345_v38 }
 0x48b   :  { %v226_v41 = vmul.f32 %v1174_v39, %v1158_v5 }
 0x48c   :  { %v470_v44 = vpop.xlane.xlu1 %469 }
 0x48e   :  { %v1176_v40 = vpop.eup %1175 }
 0x48f   :  { %v227_v42 = vmul.f32 %v1176_v40, %v1160_v10 }
 0x490   :  { %v473_v43 = vpop.xlane.xlu0 %472 }
 0x491   :  { %v228_v45 = vpack.c.bf16 %v227_v42, %v226_v41  ;;  %1181 = vrcp.f32 %v473_v43 }
 0x492   :  { %1183 = vrcp.f32 %v470_v44  ;;  %v689_v44 = vsub.s32 2, %v1304_v33 }
 0x493   :  { %1039 = vmatmul.mubr.msk.bf16.vlgmr.msra.gmra.mxu0 %vm205_vm7, %v228_v45 }
 0x494   :  { %1050 = vmatprep.mubr.msk.bf16.mxu0 %vm1220_vm1, %v1219_v15  ;;  %v595_v48 = vpop.xlane.xlu1 %594  ;;  %v690_v45 = vrot.slane %v1310_v36, %v689_v44 }
 0x496   :  { %v1178_v57 = vpop.eup %1177 }
 0x497   :  { %v1180_v47 = vpop.eup %1179  ;;  %v352_v49 = vmul.f32 %v1178_v57, %v1164_v22 }
 0x498   :  { %v598_v46 = vpop.xlane.xlu0 %597  ;;  %v351_v51 = vmul.f32 %v1180_v47, %v1162_v16  ;;  %v480_v54 = vpop.permute.xlu1 %479 }
 0x499   :  { %1185 = vrcp.f32 %v598_v46 }
 0x49a   :  { %1187 = vrcp.f32 %v595_v48  ;;  %v353_v52 = vpack.c.bf16 %v352_v49, %v351_v51 }
 0x49c   :  { %v355_v50 = vpop.permute.xlu0 %354  ;;  %v605_v61 = vpop.permute.xlu1 %604 }
 0x49d   :  { %1049 = vmatpush3.bf16.msra.mxu0 %v355_v50 }
 0x49e   :  { %1060 = vmatprep.subr.bf16.mxu0 %v1219_v15  ;;  %v1182_v53 = vpop.eup %1181 }
 0x49f   :  { %v1184_v55 = vpop.eup %1183  ;;  %v477_v56 = vmul.f32 %v1182_v53, %v1168_v27 }
 0x4a0   :  { %1051 = vmatmul.mubr.msk.bf16.vlgmr.msra.gmra.mxu0 %vm205_vm7, %v353_v52  ;;  %v476_v58 = vmul.f32 %v1184_v55, %v1166_v25 }
 0x4a1   :  { %1061 = vmatpush3.bf16.msra.mxu0 %v480_v54  ;;  %1062 = vmatprep.mubr.msk.bf16.mxu0 %vm1220_vm1, %v1219_v15 }
 0x4a2   :  { %1072 = vmatprep.subr.bf16.mxu0 %v1219_v15  ;;  %v478_v59 = vpack.c.bf16 %v477_v56, %v476_v58 }
 0x4a6   :  { %v1186_v60 = vpop.eup %1185 }
 0x4a7   :  { %v1188_v62 = vpop.eup %1187  ;;  %v602_v63 = vmul.f32 %v1186_v60, %v1172_v31 }
 0x4a8   :  { %1063 = vmatmul.mubr.msk.bf16.vlgmr.msra.gmra.mxu0 %vm205_vm7, %v478_v59  ;;  %v601_v2 = vmul.f32 %v1188_v62, %v1170_v29 }
 0x4a9   :  { %1073 = vmatpush3.bf16.msra.mxu0 %v605_v61  ;;  %1074 = vmatprep.mubr.msk.bf16.mxu0 %vm1220_vm1, %v1219_v15 }
 0x4aa   :  { %1086 = vmatprep.subr.bf16.mxu0 %v1219_v15  ;;  %v603_v3 = vpack.c.bf16 %v602_v63, %v601_v2  ;;  %v1143_v2 = vld [vmem:[%s1467_s4 + $0x8] sm:$0xff]  }
 0x4b0   :  { %1075 = vmatmul.mubr.msk.bf16.vlgmr.msra.gmra.mxu0 %vm205_vm7, %v603_v3  ;;  %v1144_v3 = vld [vmem:[%s1467_s4] sm:$0xff]  }
 0x4b1   :  { %1090 = vmatprep.mubr.msk.bf16.mxu0 %vm1220_vm1, %v1219_v15  ;;  %1087 = vmatpush3.bf16.msra.mxu0 %v1143_v2 }
 0x4b2   :  { %1088 = vmatprep.subr.bf16.mxu0 %v1219_v15 }
 0x4b5   :  { %1089 = vmatpush3.bf16.msra.mxu0 %v1144_v3 }
 0x553   :  { %v269_v4 = vpop.f32.mrf.mxu0 }
 0x555   :  { %v1040_v5 = vpop.f32.mrf.mxu0 }
 0x557   :  { %v272_v6 = vpop.f32.mrf.mxu0 }
 0x559   :  { %v1041_v7 = vpop.f32.mrf.mxu0 }
 0x560   :  { %v394_v8 = vpop.f32.mrf.mxu0 }
 0x562   :  { %v1052_v9 = vpop.f32.mrf.mxu0 }
 0x564   :  { %v397_v10 = vpop.f32.mrf.mxu0 }
 0x565   :  { %v1124_v12 = vpack.i.bf16 %v397_v10, %v394_v8 }
 0x566   :  { %v1053_v13 = vpop.f32.mrf.mxu0 }
 0x567   :  { %1125 = vrot.lane.b32.xlu1 %v1124_v12, %s1232_s20 }
 0x568   :  { %v519_v14 = vpop.f32.mrf.mxu0 }
 0x56a   :  { %v1064_v16 = vpop.f32.mrf.mxu0 }
 0x56c   :  { %v522_v18 = vpop.f32.mrf.mxu0 }
 0x56d   :  { %v1129_v19 = vpack.i.bf16 %v522_v18, %v519_v14 }
 0x56e   :  { %v1065_v20 = vpop.f32.mrf.mxu0 }
 0x56f   :  { %1130 = vrot.lane.b32.xlu0 %v1129_v19, %s1233_s23 }
 0x570   :  { %v644_v21 = vpop.f32.mrf.mxu0 }
 0x572   :  { %v1076_v22 = vpop.f32.mrf.mxu0 }
 0x573   :  { %v785_v22 = vsub.s32 3, %v1304_v33 }
 0x574   :  { %v647_v23 = vpop.f32.mrf.mxu0 }
 0x575   :  { %v1134_v24 = vpack.i.bf16 %v647_v23, %v644_v21  ;;  %v786_v23 = vrot.slane %v1310_v36, %v785_v22 }
 0x576   :  { %v1077_v25 = vpop.f32.mrf.mxu0 }
 0x577   :  { %1135 = vrot.lane.b32.xlu1 %v1134_v24, %s1234_s24  ;;  %v797_v24 = vsub.s32 4, %v1304_v33 }
 0x5d9   :  { %v1126_v26 = vpop.permute.xlu1 %1125 }
 0x5da   :  { %v1128_v28 = vunpack.i.h.bf16 %v1126_v26  ;;  %v1127_v29 = vunpack.i.l.bf16 %v1126_v26 }
 0x5dc   :  { %v676_v34 = vsel %vm153_vm6, %v272_v6, %v1128_v28  ;;  %v675_v35 = vsel %vm153_vm6, %v269_v4, %v1127_v29  ;;  %v1145_v4 = vld [vmem:[%s1467_s4 + $0x28] sm:$0xff]   ;;  %v798_v29 = vrot.slane %v1310_v36, %v797_v24 }
 0x5e1   :  { %v1131_v27 = vpop.permute.xlu0 %1130 }
 0x5e2   :  { %v1133_v30 = vunpack.i.h.bf16 %v1131_v27  ;;  %v1132_v31 = vunpack.i.l.bf16 %v1131_v27 }
 0x5e4   :  { %v678_v39 = vsel %vm205_vm7, %v676_v34, %v1133_v30  ;;  %v677_v40 = vsel %vm205_vm7, %v675_v35, %v1132_v31 }
 0x5e9   :  { %v1136_v32 = vpop.permute.xlu1 %1135 }
 0x5ea   :  { %v1138_v37 = vunpack.i.h.bf16 %v1136_v32  ;;  %v1137_v38 = vunpack.i.l.bf16 %v1136_v32 }
 0x5ec   :  { %v681_v41 = vsel %vm679_vm8, %v678_v39, %v1138_v37  ;;  %v680_v42 = vsel %vm679_vm8, %v677_v40, %v1137_v38  ;;  %v1146_v37 = vld [vmem:[%s1467_s4 + $0x20] sm:$0xff]   ;;  %v1147_v38 = vld [vmem:[%s1467_s4 + $0x18] sm:$0xff]   ;;  %v1148_v39 = vld [vmem:[%s1467_s4 + $0x10] sm:$0xff]   ;;  %v816_v40 = vsub.s32 7, %v1304_v33  ;;  %s1235_s4 = smov [#allocation2]  }
 0x5ed   :  { %v682_v43 = vpack.c.bf16 %v681_v41, %v680_v42  ;;  %s959_s9 = sshll.u32 %s1235_s4, 4  ;;  %s960_s9 = int_to_ptr.vmem [resolvable:$true] %s959_s9 }
 0x5ee   :  { %v817_v41 = vrot.slane %v1310_v36, %v816_v40  ;;  %s1197_s10 = scalar_lea.vmem %s960_s9, 256  ;;  %p1202_p1 = scmp.lt.s32.totalorder %s960_s9, %s960_s9 }
 0x5ef   :  { %1083 = vmatmul.mubr.msk.bf16.vlgmr.msra.gmra.mxu1 %vm30_vm0, %v682_v43  ;;  %p1198_p0 = scmp.ne.s32.totalorder %s960_s9, %s1197_s10  ;;  %p1203_p2 = scmp.lt.s32.totalorder %s1197_s10, %s1197_s10 }
 0x5f0   :  { %1102 = vmatprep.mubr.msk.bf16.mxu1 %vm1220_vm1, %v1219_v15  ;;  %1095 = vmatpush3.bf16.msra.mxu1 %v1145_v4 }
 0x5f1   :  { %1096 = vmatprep.subr.bf16.mxu1 %v1219_v15  ;;  %p1204_p3 = por %p1203_p2, %p1202_p1 }
 0x5f3   :  { %p1205_p4 = pnand %p1204_p3, %p1198_p0 }
 0x5f4   :  { %1097 = vmatpush3.bf16.msra.mxu1 %v1146_v37 }
 0x5f5   :  { %1098 = vmatprep.subr.bf16.mxu1 %v1219_v15 }
 0x5f8   :  { %1099 = vmatpush3.bf16.msra.mxu1 %v1147_v38 }
 0x5f9   :  { %1100 = vmatprep.subr.bf16.mxu1 %v1219_v15  ;;  %v879_v15 = vsub.s32 5, %v1304_v33 }
 0x5fc   :  { %1101 = vmatpush3.bf16.msra.mxu1 %v1148_v39 }
 0x6af   :  { %v740_v57 = vpop.f32.mrf.mxu1 }
 0x6b0   :  { %v741_v46 = vadd.f32 %v740_v57, %v690_v45 }
 0x6b1   :  { %v1084_v47 = vpop.f32.mrf.mxu1 }
 0x6b2   :  { %v1411_v48 = vadd.f32 %v741_v46, %v1275_v0 }
 0x6b3   :  { %v743_v49 = vpop.f32.mrf.mxu1 }
 0x6b4   :  { %v744_v50 = vadd.f32 %v743_v49, %v690_v45  ;;  %v749_v51 = vsel %vm30_vm0, %v1411_v48, 0.0 }
 0x6b5   :  { %750 = vadd.xlane.f32.xlu0 %v749_v51  ;;  %v1085_v52 = vpop.f32.mrf.mxu1  ;;  %v880_v51 = vrot.slane %v1310_v36, %v879_v15 }
 0x6b6   :  { %v1416_v53 = vadd.f32 %v744_v50, %v1280_v1 }
 0x6b8   :  { %v752_v54 = vsel %vm30_vm0, %v1416_v53, 0.0 }
 0x6b9   :  { %753 = vadd.xlane.f32.xlu1 %v752_v54 }
 0x73e   :  { %v751_v55 = vpop.xlane.xlu0 %750 }
 0x73f   :  { %v755_v56 = vmul.f32 0.03125, %v751_v55 }
 0x741   :  { %v757_v58 = vsub.f32 %v1411_v48, %v755_v56 }
 0x742   :  { %v754_v0 = vpop.xlane.xlu1 %753 }
 0x743   :  { %v756_v59 = vmul.f32 0.03125, %v754_v0  ;;  %v759_v60 = vmul.f32 %v757_v58, %v757_v58  ;;  %v787_v26 = vmul.f32 %v786_v23, %v757_v58 }
 0x745   :  { %v758_v61 = vsub.f32 %v1416_v53, %v756_v59  ;;  %v761_v62 = vsel %vm30_vm0, %v759_v60, 0.0 }
 0x746   :  { %762 = vadd.xlane.f32.xlu0 %v761_v62 }
 0x747   :  { %v760_v63 = vmul.f32 %v758_v61, %v758_v61  ;;  %v788_v27 = vmul.f32 %v786_v23, %v758_v61 }
 0x749   :  { %v764_v1 = vsel %vm30_vm0, %v760_v63, 0.0 }
 0x74a   :  { %765 = vadd.xlane.f32.xlu0 %v764_v1 }
 0x7cf   :  { %v763_v5 = vpop.xlane.xlu0 %762 }
 0x7d0   :  { %v767_v6 = vmul.f32 0.032258064, %v763_v5 }
 0x7d2   :  { %1189 = vrsqrt.f32 %v767_v6  ;;  %vm771_vm9 = vcmp.eq.f32.partialorder %v767_v6, inf  ;;  %v774_v11 = vand.u32 2147483648, %v767_v6  ;;  %vm773_vm10 = vcmp.eq.f32.partialorder %v767_v6, 0.0 }
 0x7d3   :  { %v766_v7 = vpop.xlane.xlu0 %765 }
 0x7d4   :  { %v768_v8 = vmul.f32 0.032258064, %v766_v7 }
 0x7d6   :  { %1191 = vrsqrt.f32 %v768_v8  ;;  %vm778_vm11 = vcmp.eq.f32.partialorder %v768_v8, inf  ;;  %v781_v18 = vand.u32 2147483648, %v768_v8  ;;  %vm780_vm12 = vcmp.eq.f32.partialorder %v768_v8, 0.0 }
 0x7df   :  { %v1190_v9 = vpop.eup %1189 }
 0x7e0   :  { %v770_v10 = vmul.f32 %v1190_v9, %v767_v6 }
 0x7e2   :  { %v772_v12 = vsel %vm771_vm9, %v767_v6, %v770_v10 }
 0x7e3   :  { %v1192_v13 = vpop.eup %1191  ;;  %v775_v14 = vsel %vm773_vm10, %v774_v11, %v772_v12 }
 0x7e4   :  { %v789_v16 = vadd.f32 1e-06, %v775_v14  ;;  %v777_v17 = vmul.f32 %v1192_v13, %v768_v8 }
 0x7e6   :  { %1193 = vrcp.f32 %v789_v16  ;;  %v779_v19 = vsel %vm778_vm11, %v768_v8, %v777_v17 }
 0x7e7   :  { %v782_v20 = vsel %vm780_vm12, %v781_v18, %v779_v19 }
 0x7e8   :  { %v790_v21 = vadd.f32 1e-06, %v782_v20 }
 0x7ea   :  { %1195 = vrcp.f32 %v790_v21 }
 0x7f3   :  { %v1194_v25 = vpop.eup %1193 }
 0x7f4   :  { %v793_v28 = vmul.f32 %v1194_v25, %v787_v26 }
 0x7f6   :  { %v799_v32 = vadd.f32 %v798_v29, %v793_v28 }
 0x7f7   :  { %v1196_v30 = vpop.eup %1195 }
 0x7f8   :  { %v794_v31 = vmul.f32 %v1196_v30, %v788_v27 }
 0x7fa   :  { %v800_v34 = vadd.f32 %v798_v29, %v794_v31 }
 0x7fc   :  { %v813_v35 = vpack.c.bf16 %v800_v34, %v799_v32 }
 0x7fe   :  { %1091 = vmatmul.mubr.msk.bf16.vlgmr.msra.gmra.mxu0 %vm30_vm0, %v813_v35 }
 0x8be   :  { %v867_v42 = vpop.f32.mrf.mxu0 }
 0x8bf   :  { %v868_v44 = vadd.f32 %v867_v42, %v817_v41 }
 0x8c0   :  { %v1092_v43 = vpop.f32.mrf.mxu0 }
 0x8c1   :  { %v874_v47 = vmax.f32 %v868_v44, 0.0 }
 0x8c2   :  { %v870_v45 = vpop.f32.mrf.mxu0 }
 0x8c3   :  { %v871_v57 = vadd.f32 %v870_v45, %v817_v41 }
 0x8c4   :  { %v1093_v46 = vpop.f32.mrf.mxu0 }
 0x8c5   :  { %v875_v49 = vmax.f32 %v871_v57, 0.0 }
 0x8c7   :  { %v876_v50 = vpack.c.bf16 %v875_v49, %v874_v47 }
 0x8c9   :  { %1103 = vmatmul.mubr.msk.bf16.vlgmr.msra.gmra.mxu1 %vm905_vm13, %v876_v50 }
 0x989   :  { %v943_v52 = vpop.f32.mrf.mxu1 }
 0x98a   :  { %v944_v54 = vadd.f32 %v943_v52, %v880_v51 }
 0x98b   :  { %v1104_v55 = vpop.f32.mrf.mxu1 }
 0x98c   :  { %v950_v56 = vadd.f32 %v944_v54, %v1411_v48 }
 0x98d   :  { %v946_v58 = vpop.f32.mrf.mxu1 }
 0x98e   :  { %952 = vst.msk [vmem:[#allocation2] sm:$0xff] %vm30_vm0, %v950_v56  ;;  %v947_v0 = vadd.f32 %v946_v58, %v880_v51 }
 0x98f   :  { %v1105_v59 = vpop.f32.mrf.mxu1 }
 0x990   :  { %v951_v60 = vadd.f32 %v947_v0, %v1416_v53 }
 0x992   :  { %953 = vst.msk [vmem:[#allocation2 + $0x8] sm:$0xff] %vm30_vm0, %v951_v60 }
 0x993   :  { %1208 = shalt.err (!%p1205_p4)
}
 0x994   :  { %s1236_s11 = smov 128  }
 0x995   :  { %965 = dma.vmem_to_hbm [thread:$0]  %s960_s9, 256, %s1469_s6, [#allocation3], %s1236_s11, %s1236_s11, %s1232_s20  }
 0x996   :  { %1217 = dma.done.wait [#allocation3], 256  }
 0x997   :  { %1218 = vsyncadd [#allocation3], 4294967040 }
 0x998   :  { %969 = vsyncpa [#allocation3], 1 }

</bundles_post_ra>
